<compile_context>
chip_gen: v7x
topology: tpu7x:2x2x1
jax: 0.10.0
libtpu: 0.0.40
codegen_flags: <defaults>
</compile_context>

<pallas_src>
import functools

import jax
import jax.numpy as jnp
import numpy as np
from jax import lax
from jax.experimental import pallas as pl
from jax.experimental.pallas import tpu as pltpu

MAXPAD = 7          # (15 - 1) // 2, the largest conv padding
KF = 15             # fused kernel width
POOL_OUT = 5        # AdaptiveAvgPool1d(5)
HID = 32            # hidden width of the first Linear
BN_EPS = 1e-5


def _round_up(n, m):
    return -(-n // m) * m


def _adaptive_pool_matrix_np(L, out):
    """P[i, l] = 1/bin_len if l falls in PyTorch AdaptiveAvgPool1d bin i."""
    P = np.zeros((out, L), dtype=np.float32)
    for i in range(out):
        s = (i * L) // out
        e = -((-(i + 1) * L) // out)          # ceil((i+1)*L/out)
        P[i, s:e] = 1.0 / (e - s)
    return P


def _vmem_capacity_bytes():
    try:
        return int(pltpu.get_tpu_info().vmem_capacity_bytes)
    except Exception:
        return 64 << 20                        # conservative (v7x-sized) fallback


def _pick_tb(B, L, kfe_pad, cep, hidp, out_pad, vmem_bytes):
    """Rows per grid step, sized from live-VMEM per batch row."""
    per_row = (2 * L * kfe_pad * 2             # bf16 cols tile, double-buffered
               + 2 * L * cep * 4               # f32 conv output + relayout copy
               + L * cep * 2                   # bf16 flat operand
               + 2 * (hidp + out_pad) * 4)     # h / out (out double-buffered)
    budget = min(vmem_bytes // 4, 16 << 20)    # stay well under scoped VMEM
    cap = max(16, min(512, (budget // per_row) // 16 * 16))
    if B <= cap:
        return B, 1
    nsteps = -(-B // cap)
    return cap, nsteps


def _make_kernel(TB, L, KFEp, CEp):
    def kernel(cols_ref, wf_ref, bf_ref, w1_ref, b1_ref, w2_ref, b2_ref, out_ref):
        # Fused 15-tap conv for all three Conv1ds: one (TB*L, 512)@(512, 128)
        # bf16 MXU matmul (im2col already done in the wrapper).
        cols = cols_ref[...].reshape(TB * L, KFEp)                     # bf16
        y = jnp.dot(cols, wf_ref[...], preferred_element_type=jnp.float32)
        y = jnp.maximum(y + bf_ref[...], 0.0)                          # (TB*L, CEp) f32

        # AdaptiveAvgPool1d(5) + Linear(15E->32) folded into one matmul with
        # the precomputed W1eff (pool matrix absorbed in the wrapper).
        flat = y.reshape(TB, L * CEp).astype(jnp.bfloat16)             # (TB, L*CEp)
        h = jnp.dot(flat, w1_ref[...], preferred_element_type=jnp.float32)
        h = jnp.maximum(h + b1_ref[...], 0.0)                          # (TB, HIDp) f32

        # Dropout = identity (eval); BatchNorm(eval) folded into w2/b2.
        out = jnp.dot(h, w2_ref[...], preferred_element_type=jnp.float32) + b2_ref[...]
        out_ref[...] = out.astype(out_ref.dtype)                       # (TB, OUTp)

    return kernel


def _forward_impl(x, p, output_dim, mask=None, sequence_lengths=None,
                  frequencies=None):
    """x: [B, E, L] (same as the PyTorch module). mask/lengths/frequencies unused."""
    B, E, L = x.shape
    CE = 3 * E
    CEp = _round_up(CE, 128)
    KFEp = _round_up(KF * E, 128)
    HIDp = _round_up(HID, 128)
    OUTp = _round_up(output_dim, 128)

    vmem_bytes = _vmem_capacity_bytes()
    TB, nsteps = _pick_tb(B, L, KFEp, CEp, HIDp, OUTp, vmem_bytes)
    B_pad = TB * nsteps

    # ---- input prep: transpose to channels-last, pad L, im2col (lane-dense).
    # All of this is XLA-fused under jit; the kernel sees full 128-lane tiles.
    xt = jnp.transpose(x, (0, 2, 1)).astype(jnp.float32)               # (B, L, E)
    xt = jnp.pad(xt, ((0, B_pad - B), (MAXPAD, MAXPAD), (0, 0)))       # (B_pad, L+14, E)
    cols = jnp.concatenate([xt[:, k:k + L, :] for k in range(KF)], axis=-1)  # (B_pad, L, 15E)
    cols = jnp.pad(cols, ((0, 0), (0, 0), (0, KFEp - KF * E))).astype(jnp.bfloat16)

    # ---- fused conv weight: conv1 (K=3, pad=1 -> taps 6..8) and conv3
    # (K=9, pad=4 -> taps 3..11) zero-padded to K=15; concat output channels.
    wt1 = jnp.transpose(p["conv1_w"], (2, 1, 0))                       # (3,  E, E)
    wt2 = jnp.transpose(p["conv2_w"], (2, 1, 0))                       # (15, E, E)
    wt3 = jnp.transpose(p["conv3_w"], (2, 1, 0))                       # (9,  E, E)
    wf = jnp.zeros((KF, E, CE), jnp.float32)
    wf = wf.at[MAXPAD - 1:MAXPAD - 1 + 3, :, 0:E].set(wt1)
    wf = wf.at[:, :, E:2 * E].set(wt2)
    wf = wf.at[MAXPAD - 4:MAXPAD - 4 + 9, :, 2 * E:3 * E].set(wt3)
    wfp = jnp.zeros((KFEp, CEp), jnp.float32).at[:KF * E, :CE].set(
        wf.reshape(KF * E, CE)).astype(jnp.bfloat16)
    bfp = jnp.zeros((1, CEp), jnp.float32).at[0, :CE].set(
        jnp.concatenate([p["conv1_b"], p["conv2_b"], p["conv3_b"]]))

    # ---- AdaptiveAvgPool folded into Linear(15E -> 32):
    # h[b,o] = sum_{l,c} y[b,l,c] * W1eff[l*CEp + c, o],
    # W1eff[l*CEp+c, o] = sum_p PT[p,l] * lin_w[o, c*5+p] (torch channel-major flatten).
    PT = jnp.asarray(_adaptive_pool_matrix_np(L, POOL_OUT))            # (5, L)
    lin_w_r = p["lin_w"].reshape(HID, CE, POOL_OUT)                    # [o, c, p]
    W1 = jnp.einsum("ocp,pl->lco", lin_w_r, PT)                        # (L, CE, HID)
    W1eff = jnp.zeros((L, CEp, HIDp), jnp.float32).at[:, :CE, :HID].set(W1)
    W1eff = W1eff.reshape(L * CEp, HIDp).astype(jnp.bfloat16)          # (L*CEp, 128)
    b1p = jnp.zeros((1, HIDp), jnp.float32).at[0, :HID].set(p["lin_b"])

    # ---- fold eval-mode BatchNorm (after ReLU) into the output Linear; pad
    # hidden and output lanes to 128 for unmasked vregs/stores.
    scale = p["bn_gamma"] / jnp.sqrt(p["bn_var"] + BN_EPS)             # (32,)
    shift = p["bn_beta"] - p["bn_mean"] * scale                        # (32,)
    wl2 = scale[:, None] * p["out_w"].T                                # (32, OUT)
    bl2 = p["out_b"] + shift @ p["out_w"].T                            # (OUT,)
    w2p = jnp.zeros((HIDp, OUTp), jnp.float32).at[:HID, :output_dim].set(wl2)
    b2p = jnp.zeros((1, OUTp), jnp.float32).at[0, :output_dim].set(bl2)

    kernel = _make_kernel(TB, L, KFEp, CEp)
    full2d = lambda b: (0, 0)    # fully resident 2-D weights

    out = pl.pallas_call(
        kernel,
        out_shape=jax.ShapeDtypeStruct((B_pad, OUTp), jnp.float32),
        grid=(nsteps,),
        in_specs=[pl.BlockSpec((TB, L, KFEp), lambda b: (b, 0, 0)),
                  pl.BlockSpec(wfp.shape, full2d),
                  pl.BlockSpec(bfp.shape, full2d),
                  pl.BlockSpec(W1eff.shape, full2d),
                  pl.BlockSpec(b1p.shape, full2d),
                  pl.BlockSpec(w2p.shape, full2d),
                  pl.BlockSpec(b2p.shape, full2d)],
        out_specs=pl.BlockSpec((TB, OUTp), lambda b: (b, 0)),
        compiler_params=pltpu.CompilerParams(
            dimension_semantics=("parallel",),
            vmem_limit_bytes=int(min(vmem_bytes // 2, 96 << 20))),
    )(cols, wfp, bfp, W1eff, b1p, w2p, b2p)

    return out[:B, :output_dim]


# Jit the whole forward so the weight preprocessing above is compiled/fused
# once per shape instead of running eagerly on every call.
adaptive_pooling_forward = jax.jit(_forward_impl, static_argnums=(2,))


def reference_forward(x, p, output_dim):
    """Pure-JAX reference mirroring the PyTorch forward (eval mode)."""
    def conv_relu(x, w, b, pad):
        y = lax.conv_general_dilated(x, w, window_strides=(1,), padding=[(pad, pad)],
                                     dimension_numbers=("NCH", "OIH", "NCH"))
        return jax.nn.relu(y + b[None, :, None])

    o1 = conv_relu(x, p["conv1_w"], p["conv1_b"], 1)
    o2 = conv_relu(x, p["conv2_w"], p["conv2_b"], 7)
    o3 = conv_relu(x, p["conv3_w"], p["conv3_b"], 4)
    o = jnp.concatenate([o1, o2, o3], axis=1)                     # (B, 3E, L)
    B, C, L = o.shape
    PT = jnp.asarray(_adaptive_pool_matrix_np(L, POOL_OUT))
    pooled = jnp.einsum("bcl,pl->bcp", o, PT)                     # (B, 3E, 5)
    flat = pooled.reshape(B, -1)
    h = flat @ p["lin_w"].T + p["lin_b"]
    h = jax.nn.relu(h)                                            # dropout = identity (eval)
    h = (h - p["bn_mean"]) / jnp.sqrt(p["bn_var"] + BN_EPS) * p["bn_gamma"] + p["bn_beta"]
    return h @ p["out_w"].T + p["out_b"]


if __name__ == "__main__":
    # Small shapes consistent with the module: embeddings_dim=32, seq=16,
    # batch=2, output_dim=11, hidden=32 (fixed by the module definition).
    B, E, L, OUT = 2, 32, 16, 11

    key = jax.random.PRNGKey(0)
    keys = jax.random.split(key, 16)

    def rnd(k, shape, s=0.1):
        return s * jax.random.normal(k, shape, jnp.float32)

    params = {
        "conv1_w": rnd(keys[0], (E, E, 3)),   "conv1_b": rnd(keys[1], (E,)),
        "conv2_w": rnd(keys[2], (E, E, 15)),  "conv2_b": rnd(keys[3], (E,)),
        "conv3_w": rnd(keys[4], (E, E, 9)),   "conv3_b": rnd(keys[5], (E,)),
        "lin_w":   rnd(keys[6], (HID, POOL_OUT * 3 * E)),
        "lin_b":   rnd(keys[7], (HID,)),
        "bn_gamma": 1.0 + rnd(keys[8], (HID,)),
        "bn_beta":  rnd(keys[9], (HID,)),
        "bn_mean":  rnd(keys[10], (HID,)),
        "bn_var":   1.0 + 0.1 * jnp.abs(jax.random.normal(keys[11], (HID,), jnp.float32)),
        "out_w":   rnd(keys[12], (OUT, HID)), "out_b": rnd(keys[13], (OUT,)),
    }

    x = jax.random.normal(keys[14], (B, E, L), jnp.float32)

    out = adaptive_pooling_forward(x, params, OUT)
    out = jax.block_until_ready(out)

    ref = reference_forward(x, params, OUT)
    assert out.shape == (B, OUT), out.shape
    # bf16 MXU operands (f32 accumulation) -> loosened tolerance vs pure-f32 ref.
    assert jnp.allclose(out, ref, atol=3e-2, rtol=3e-2), (
        f"mismatch: max abs diff {jnp.max(jnp.abs(out - ref))}")

    print("KERNEL_OK")
</pallas_src>

<mosaic_0001>
module attributes {stable_mosaic.version = 11 : i64} {
  func.func @kernel(%arg0: i32, %arg1: memref<2x16x512xbf16, #tpu.memory_space<vmem>>, %arg2: memref<512x128xbf16, #tpu.memory_space<vmem>>, %arg3: memref<1x128xf32, #tpu.memory_space<vmem>>, %arg4: memref<2048x128xbf16, #tpu.memory_space<vmem>>, %arg5: memref<1x128xf32, #tpu.memory_space<vmem>>, %arg6: memref<128x128xf32, #tpu.memory_space<vmem>>, %arg7: memref<1x128xf32, #tpu.memory_space<vmem>>, %arg8: memref<2x128xf32, #tpu.memory_space<vmem>>) attributes {dimension_semantics = [#tpu.dimension_semantics<parallel>], iteration_bounds = array<i64: 1>, scalar_prefetch = 0 : i64, scratch_operands = 0 : i64, tpu.core_type = #tpu.core_type<tc>, window_params = [{transform_indices = @transform_0, window_bounds = array<i64: 2, 16, 512>}, {pipeline_mode = #tpu.pipeline_mode<synchronous>, transform_indices = @transform_1, window_bounds = array<i64: 512, 128>}, {pipeline_mode = #tpu.pipeline_mode<synchronous>, transform_indices = @transform_2, window_bounds = array<i64: 1, 128>}, {pipeline_mode = #tpu.pipeline_mode<synchronous>, transform_indices = @transform_3, window_bounds = array<i64: 2048, 128>}, {pipeline_mode = #tpu.pipeline_mode<synchronous>, transform_indices = @transform_4, window_bounds = array<i64: 1, 128>}, {pipeline_mode = #tpu.pipeline_mode<synchronous>, transform_indices = @transform_5, window_bounds = array<i64: 128, 128>}, {pipeline_mode = #tpu.pipeline_mode<synchronous>, transform_indices = @transform_6, window_bounds = array<i64: 1, 128>}, {transform_indices = @transform_7, window_bounds = array<i64: 2, 128>}]} {
    %c0 = arith.constant 0 : index
    %c0_0 = arith.constant 0 : index
    %c0_1 = arith.constant 0 : index
    %0 = vector.load %arg1[%c0, %c0_0, %c0_1] : memref<2x16x512xbf16, #tpu.memory_space<vmem>>, vector<2x16x512xbf16>
    %1 = vector.shape_cast %0 : vector<2x16x512xbf16> to vector<32x512xbf16>
    %c0_2 = arith.constant 0 : index
    %c0_3 = arith.constant 0 : index
    %2 = vector.load %arg2[%c0_2, %c0_3] : memref<512x128xbf16, #tpu.memory_space<vmem>>, vector<512x128xbf16>
    %cst = arith.constant dense<0.000000e+00> : vector<32x128xf32>
    %3 = tpu.matmul %1, %2, %cst {dimension_numbers = #tpu.dot_dimension_numbers<[1], [0], [0], [1], [0, 0, 1, 1], [], []>} : vector<32x512xbf16>, vector<512x128xbf16>, vector<32x128xf32> -> vector<32x128xf32>
    %c0_4 = arith.constant 0 : index
    %c0_5 = arith.constant 0 : index
    %4 = vector.load %arg3[%c0_4, %c0_5] : memref<1x128xf32, #tpu.memory_space<vmem>>, vector<1x128xf32>
    %5 = vector.broadcast %4 : vector<1x128xf32> to vector<32x128xf32>
    %6 = arith.addf %3, %5 : vector<32x128xf32>
    %cst_6 = arith.constant 0.000000e+00 : f32
    %7 = vector.broadcast %cst_6 : f32 to vector<32x128xf32>
    %8 = arith.maximumf %6, %7 : vector<32x128xf32>
    %9 = vector.shape_cast %8 : vector<32x128xf32> to vector<2x2048xf32>
    %10 = arith.truncf %9 : vector<2x2048xf32> to vector<2x2048xbf16>
    %c0_7 = arith.constant 0 : index
    %c0_8 = arith.constant 0 : index
    %11 = vector.load %arg4[%c0_7, %c0_8] : memref<2048x128xbf16, #tpu.memory_space<vmem>>, vector<2048x128xbf16>
    %cst_9 = arith.constant dense<0.000000e+00> : vector<2x128xf32>
    %12 = tpu.matmul %10, %11, %cst_9 {dimension_numbers = #tpu.dot_dimension_numbers<[1], [0], [0], [1], [0, 0, 1, 1], [], []>} : vector<2x2048xbf16>, vector<2048x128xbf16>, vector<2x128xf32> -> vector<2x128xf32>
    %c0_10 = arith.constant 0 : index
    %c0_11 = arith.constant 0 : index
    %13 = vector.load %arg5[%c0_10, %c0_11] : memref<1x128xf32, #tpu.memory_space<vmem>>, vector<1x128xf32>
    %14 = vector.broadcast %13 : vector<1x128xf32> to vector<2x128xf32>
    %15 = arith.addf %12, %14 : vector<2x128xf32>
    %cst_12 = arith.constant 0.000000e+00 : f32
    %16 = vector.broadcast %cst_12 : f32 to vector<2x128xf32>
    %17 = arith.maximumf %15, %16 : vector<2x128xf32>
    %c0_13 = arith.constant 0 : index
    %c0_14 = arith.constant 0 : index
    %18 = vector.load %arg6[%c0_13, %c0_14] : memref<128x128xf32, #tpu.memory_space<vmem>>, vector<128x128xf32>
    %cst_15 = arith.constant dense<0.000000e+00> : vector<2x128xf32>
    %19 = tpu.matmul %17, %18, %cst_15 {dimension_numbers = #tpu.dot_dimension_numbers<[1], [0], [0], [1], [0, 0, 1, 1], [], []>} : vector<2x128xf32>, vector<128x128xf32>, vector<2x128xf32> -> vector<2x128xf32>
    %c0_16 = arith.constant 0 : index
    %c0_17 = arith.constant 0 : index
    %20 = vector.load %arg7[%c0_16, %c0_17] : memref<1x128xf32, #tpu.memory_space<vmem>>, vector<1x128xf32>
    %21 = vector.broadcast %20 : vector<1x128xf32> to vector<2x128xf32>
    %22 = arith.addf %19, %21 : vector<2x128xf32>
    %c0_18 = arith.constant 0 : index
    %c0_19 = arith.constant 0 : index
    %23 = vector.load %arg8[%c0_18, %c0_19] : memref<2x128xf32, #tpu.memory_space<vmem>>, vector<2x128xf32>
    tpu.vector_store %arg8[%c0_18, %c0_19], %22 {strides = array<i32>} : memref<2x128xf32, #tpu.memory_space<vmem>>, vector<2x128xf32>,
    return
  }
  func.func @transform_0(%arg0: i32) -> (i32, i32, i32) {
    %c0_i32 = arith.constant 0 : i32
    %c0_i32_0 = arith.constant 0 : i32
    %c0_i32_1 = arith.constant 0 : i32
    return %arg0, %c0_i32, %c0_i32_0 : i32, i32, i32
  }
  func.func @transform_1(%arg0: i32) -> (i32, i32) {
    %c0_i32 = arith.constant 0 : i32
    %c0_i32_0 = arith.constant 0 : i32
    %c0_i32_1 = arith.constant 0 : i32
    return %c0_i32, %c0_i32_0 : i32, i32
  }
  func.func @transform_2(%arg0: i32) -> (i32, i32) {
    %c0_i32 = arith.constant 0 : i32
    %c0_i32_0 = arith.constant 0 : i32
    %c0_i32_1 = arith.constant 0 : i32
    return %c0_i32, %c0_i32_0 : i32, i32
  }
  func.func @transform_3(%arg0: i32) -> (i32, i32) {
    %c0_i32 = arith.constant 0 : i32
    %c0_i32_0 = arith.constant 0 : i32
    %c0_i32_1 = arith.constant 0 : i32
    return %c0_i32, %c0_i32_0 : i32, i32
  }
  func.func @transform_4(%arg0: i32) -> (i32, i32) {
    %c0_i32 = arith.constant 0 : i32
    %c0_i32_0 = arith.constant 0 : i32
    %c0_i32_1 = arith.constant 0 : i32
    return %c0_i32, %c0_i32_0 : i32, i32
  }
  func.func @transform_5(%arg0: i32) -> (i32, i32) {
    %c0_i32 = arith.constant 0 : i32
    %c0_i32_0 = arith.constant 0 : i32
    %c0_i32_1 = arith.constant 0 : i32
    return %c0_i32, %c0_i32_0 : i32, i32
  }
  func.func @transform_6(%arg0: i32) -> (i32, i32) {
    %c0_i32 = arith.constant 0 : i32
    %c0_i32_0 = arith.constant 0 : i32
    %c0_i32_1 = arith.constant 0 : i32
    return %c0_i32, %c0_i32_0 : i32, i32
  }
  func.func @transform_7(%arg0: i32) -> (i32, i32) {
    %c0_i32 = arith.constant 0 : i32
    %c0_i32_0 = arith.constant 0 : i32
    return %arg0, %c0_i32 : i32, i32
  }
}

</mosaic_0001>

<bundles_post_ra>
// kernel: _forward_impl.1
= control target key start
LH: loop header
LB: loop body
LE: loop exit
PB: predicated region body
PF: predicated region fallthrough
CT: control target
= control target key end

     0   :  { %s3377_s0 = inlined_call_operand.vmem [shape: bf16[2,16,512], index: 0, kind: input, shape index: {}]   ;;  %s3378_s1 = inlined_call_operand.vmem [shape: bf16[512,128], index: 1, kind: input, shape index: {}]   ;;  %s3379_s2 = inlined_call_operand.vmem [shape: f32[1,128], index: 2, kind: input, shape index: {}]   ;;  %s3380_s3 = inlined_call_operand.vmem [shape: bf16[2048,128], index: 3, kind: input, shape index: {}]   ;;  %s3381_s4 = inlined_call_operand.vmem [shape: f32[1,128], index: 4, kind: input, shape index: {}]   ;;  %s3382_s5 = inlined_call_operand.vmem [shape: f32[128,128], index: 5, kind: input, shape index: {}]   ;;  %s3383_s6 = inlined_call_operand.vmem [shape: f32[1,128], index: 6, kind: input, shape index: {}]   ;;  %s3384_s7 = inlined_call_operand.hbm [shape: f32[2,128], index: 7, kind: output, shape index: {}]  }
   0x1   :  { %v2521_v0 = vld [vmem:[%s3378_s1 + $0x40] sm:$0xff]   ;;  %v2525_v4 = vld [vmem:[%s3378_s1 + $0x48] sm:$0xff]   ;;  %v2529_v8 = vld [vmem:[%s3378_s1 + $0x50] sm:$0xff]  }
   0x2   :  { %v2522_v1 = vld [vmem:[%s3378_s1 + $0xc0] sm:$0xff]   ;;  %2208 = vmatprep.subr.bf16.mxu0 %v2521_v0  ;;  %v2526_v5 = vld [vmem:[%s3378_s1 + $0xc8] sm:$0xff]   ;;  %v2530_v9 = vld [vmem:[%s3378_s1 + $0xd0] sm:$0xff]  }
   0x3   :  { %v2523_v2 = vld [vmem:[%s3378_s1] sm:$0xff]   ;;  %2236 = vmatprep.subr.bf16.mxu1 %v2522_v1  ;;  %v2527_v6 = vld [vmem:[%s3378_s1 + $0x8] sm:$0xff]   ;;  %v2531_v10 = vld [vmem:[%s3378_s1 + $0x10] sm:$0xff]  }
   0x4   :  { %v2524_v3 = vld [vmem:[%s3378_s1 + $0x80] sm:$0xff]   ;;  %2209 = vmatpush3.bf16.msra.mxu0 %v2523_v2  ;;  %v2528_v7 = vld [vmem:[%s3378_s1 + $0x88] sm:$0xff]   ;;  %v2532_v11 = vld [vmem:[%s3378_s1 + $0x90] sm:$0xff]  }
   0x5   :  { %2237 = vmatpush3.bf16.msra.mxu1 %v2524_v3  ;;  %2210 = vmatprep.subr.bf16.mxu0 %v2525_v4  ;;  %v2533_v12 = vld [vmem:[%s3378_s1 + $0x58] sm:$0xff]   ;;  %v2537_v16 = vld [vmem:[%s3378_s1 + $0x60] sm:$0xff]   ;;  %v2541_v20 = vld [vmem:[%s3378_s1 + $0x68] sm:$0xff]  }
   0x6   :  { %2238 = vmatprep.subr.bf16.mxu1 %v2526_v5  ;;  %v2534_v13 = vld [vmem:[%s3378_s1 + $0xd8] sm:$0xff]   ;;  %v2538_v17 = vld [vmem:[%s3378_s1 + $0xe0] sm:$0xff]   ;;  %v2542_v21 = vld [vmem:[%s3378_s1 + $0xe8] sm:$0xff]  }
   0x7   :  { %v2535_v14 = vld [vmem:[%s3378_s1 + $0x18] sm:$0xff]   ;;  %v2539_v18 = vld [vmem:[%s3378_s1 + $0x20] sm:$0xff]   ;;  %v2543_v22 = vld [vmem:[%s3378_s1 + $0x28] sm:$0xff]  }
   0x8   :  { %2211 = vmatpush3.bf16.msra.mxu0 %v2527_v6  ;;  %v2536_v15 = vld [vmem:[%s3378_s1 + $0x98] sm:$0xff]   ;;  %v2540_v19 = vld [vmem:[%s3378_s1 + $0xa0] sm:$0xff]   ;;  %v2544_v23 = vld [vmem:[%s3378_s1 + $0xa8] sm:$0xff]  }
   0x9   :  { %2239 = vmatpush3.bf16.msra.mxu1 %v2528_v7  ;;  %2212 = vmatprep.subr.bf16.mxu0 %v2529_v8  ;;  %v2545_v24 = vld [vmem:[%s3378_s1 + $0x70] sm:$0xff]   ;;  %v2549_v28 = vld [vmem:[%s3378_s1 + $0x78] sm:$0xff]   ;;  %v2565_v39 = vld [vmem:[%s3380_s3 + $0x40] sm:$0xff]  }
   0xa   :  { %2240 = vmatprep.subr.bf16.mxu1 %v2530_v9  ;;  %v2546_v25 = vld [vmem:[%s3378_s1 + $0xf0] sm:$0xff]   ;;  %v2550_v29 = vld [vmem:[%s3378_s1 + $0xf8] sm:$0xff]   ;;  %v2566_v41 = vld [vmem:[%s3380_s3] sm:$0xff]  }
   0xb   :  { %v2547_v26 = vld [vmem:[%s3378_s1 + $0x30] sm:$0xff]   ;;  %v2551_v30 = vld [vmem:[%s3378_s1 + $0x38] sm:$0xff]   ;;  %v2567_v42 = vld [vmem:[%s3380_s3 + $0xc0] sm:$0xff]  }
   0xc   :  { %2213 = vmatpush3.bf16.msra.mxu0 %v2531_v10  ;;  %v2548_v27 = vld [vmem:[%s3378_s1 + $0xb0] sm:$0xff]   ;;  %v2552_v31 = vld [vmem:[%s3378_s1 + $0xb8] sm:$0xff]   ;;  %v2568_v43 = vld [vmem:[%s3380_s3 + $0x80] sm:$0xff]  }
   0xd   :  { %2241 = vmatpush3.bf16.msra.mxu1 %v2532_v11  ;;  %2214 = vmatprep.subr.bf16.mxu0 %v2533_v12  ;;  %v2553_v32 = vld [vmem:[%s3377_s0] ss:$16 sps:$4 sm:$0xff]   ;;  %v2555_v33 = vld [vmem:[%s3377_s0 + $0x4] ss:$16 sps:$4 sm:$0xff]   ;;  %v2556_v34 = vld [vmem:[%s3377_s0 + $0x8] ss:$16 sps:$4 sm:$0xff]  }
   0xe   :  { %2242 = vmatprep.subr.bf16.mxu1 %v2534_v13  ;;  %v2558_v35 = vld [vmem:[%s3377_s0 + $0xc] ss:$16 sps:$4 sm:$0xff]   ;;  %371 = vmatprep.mubr.bf16.mxu0 %v2555_v33  ;;  %v2559_v36 = vld [vmem:[%s3377_s0 + $0x24] ss:$16 sps:$4 sm:$0xff]   ;;  %v2563_v38 = vld [vmem:[%s3377_s0 + $0x20] ss:$16 sps:$4 sm:$0xff]  }
   0xf   :  { %420 = vmatprep.mubr.bf16.mxu1 %v2558_v35  ;;  %v2561_v37 = vld [vmem:[%s3377_s0 + $0x2c] ss:$16 sps:$4 sm:$0xff]   ;;  %v2564_v40 = vld [vmem:[%s3377_s0 + $0x28] ss:$16 sps:$4 sm:$0xff]   ;;  %v2573_v48 = vld [vmem:[%s3380_s3 + $0x50] sm:$0xff]  }
  0x10   :  { %2215 = vmatpush3.bf16.msra.mxu0 %v2535_v14  ;;  %v2569_v44 = vld [vmem:[%s3380_s3 + $0x48] sm:$0xff]   ;;  %v2574_v49 = vld [vmem:[%s3380_s3 + $0x10] sm:$0xff]   ;;  %v2577_v52 = vld [vmem:[%s3380_s3 + $0x58] sm:$0xff]  }
  0x11   :  { %2243 = vmatpush3.bf16.msra.mxu1 %v2536_v15  ;;  %2216 = vmatprep.subr.bf16.mxu0 %v2537_v16  ;;  %v2570_v45 = vld [vmem:[%s3380_s3 + $0x8] sm:$0xff]   ;;  %v2575_v50 = vld [vmem:[%s3380_s3 + $0xd0] sm:$0xff]   ;;  %v2578_v53 = vld [vmem:[%s3380_s3 + $0x18] sm:$0xff]  }
  0x12   :  { %2244 = vmatprep.subr.bf16.mxu1 %v2538_v17  ;;  %v2571_v46 = vld [vmem:[%s3380_s3 + $0xc8] sm:$0xff]   ;;  %v2576_v51 = vld [vmem:[%s3380_s3 + $0x90] sm:$0xff]  }
  0x13   :  { %v2572_v47 = vld [vmem:[%s3380_s3 + $0x88] sm:$0xff]  }
  0x14   :  { %2217 = vmatpush3.bf16.msra.mxu0 %v2539_v18 }
  0x15   :  { %2245 = vmatpush3.bf16.msra.mxu1 %v2540_v19  ;;  %2218 = vmatprep.subr.bf16.mxu0 %v2541_v20 }
  0x16   :  { %2246 = vmatprep.subr.bf16.mxu1 %v2542_v21 }
  0x18   :  { %2219 = vmatpush3.bf16.msra.mxu0 %v2543_v22 }
  0x19   :  { %2247 = vmatpush3.bf16.msra.mxu1 %v2544_v23  ;;  %2220 = vmatprep.subr.bf16.mxu0 %v2545_v24 }
  0x1a   :  { %2248 = vmatprep.subr.bf16.mxu1 %v2546_v25 }
  0x1c   :  { %2221 = vmatpush3.bf16.msra.mxu0 %v2547_v26 }
  0x1d   :  { %2249 = vmatpush3.bf16.msra.mxu1 %v2548_v27  ;;  %2222 = vmatprep.subr.bf16.mxu0 %v2549_v28 }
  0x1e   :  { %2250 = vmatprep.subr.bf16.mxu1 %v2550_v29 }
  0x20   :  { %2223 = vmatpush3.bf16.msra.mxu0 %v2551_v30 }
  0x21   :  { %2251 = vmatpush3.bf16.msra.mxu1 %v2552_v31  ;;  %2264 = vmatprep.subr.bf16.mxu0 %v2565_v39 }
  0x22   :  { %2286 = vmatprep.subr.bf16.mxu1 %v2567_v42 }
  0x23   :  { %372 = vmatmul.mubr.bf16.vlgmr.msra.gmra.mrb[0].mxu0 %v2553_v32 }
  0x24   :  { %421 = vmatmul.mubr.bf16.vlgmr.msra.gmra.mrb[0].mxu1 %v2556_v34  ;;  %379 = vmatprep.mubr.bf16.mxu0 %v2559_v36 }
  0x25   :  { %428 = vmatprep.mubr.bf16.mxu1 %v2561_v37  ;;  %2265 = vmatpush3.bf16.msra.mxu0 %v2566_v41 }
  0x26   :  { %2287 = vmatpush3.bf16.msra.mxu1 %v2568_v43  ;;  %2266 = vmatprep.subr.bf16.mxu0 %v2569_v44 }
  0x27   :  { %2288 = vmatprep.subr.bf16.mxu1 %v2571_v46 }
  0x29   :  { %2267 = vmatpush3.bf16.msra.mxu0 %v2570_v45 }
  0x2a   :  { %2289 = vmatpush3.bf16.msra.mxu1 %v2572_v47  ;;  %2268 = vmatprep.subr.bf16.mxu0 %v2573_v48 }
  0x2b   :  { %380 = vmatmul.mubr.bf16.gmra.mrb[4].mxu0 %v2563_v38  ;;  %2290 = vmatprep.subr.bf16.mxu1 %v2575_v50 }
  0x2c   :  { %429 = vmatmul.mubr.bf16.gmra.mrb[4].mxu1 %v2564_v40 }
  0x2d   :  { %2269 = vmatpush3.bf16.msra.mxu0 %v2574_v49 }
  0x2e   :  { %2291 = vmatpush3.bf16.msra.mxu1 %v2576_v51 }
  0x2f   :  { %12 = vsyncpa [#allocation3], 0  ;;  %2270 = vmatprep.subr.bf16.mxu0 %v2577_v52  ;;  %v2579_v54 = vld [vmem:[%s3380_s3 + $0xd8] sm:$0xff]   ;;  %v2581_v56 = vld [vmem:[%s3380_s3 + $0x60] sm:$0xff]   ;;  %v2717_v28 = vmov 1966171168   ;;  %v450_v30 = vlaneseq }
  0x30   :  { %v2580_v55 = vld [vmem:[%s3380_s3 + $0x98] sm:$0xff]   ;;  %2292 = vmatprep.subr.bf16.mxu1 %v2579_v54  ;;  %v2582_v57 = vld [vmem:[%s3380_s3 + $0x20] sm:$0xff]   ;;  %v2585_v60 = vld [vmem:[%s3380_s3 + $0x68] sm:$0xff]   ;;  %v448_v29 = vunpack.c.l.s4 %v2717_v28  ;;  %vm2719_vm0 = vmmov 0   ;;  %s2721_s17 = smov [#allocation2]  }
  0x31   :  { %2271 = vmatpush3.bf16.msra.mxu0 %v2578_v53  ;;  %v2583_v58 = vld [vmem:[%s3380_s3 + $0xe0] sm:$0xff]   ;;  %v2586_v61 = vld [vmem:[%s3380_s3 + $0x28] sm:$0xff]   ;;  %v2589_v0 = vld [vmem:[%s3380_s3 + $0x70] sm:$0xff]   ;;  %v451_v41 = vshrl.u32 %v450_v30, 7  ;;  %s2029_s18 = sshll.u32 %s2721_s17, 4  ;;  %s2030_s18 = int_to_ptr.vmem [resolvable:$true] %s2029_s18 }
  0x32   :  { %2293 = vmatpush3.bf16.msra.mxu1 %v2580_v55  ;;  %2272 = vmatprep.subr.bf16.mxu0 %v2581_v56  ;;  %v2584_v59 = vld [vmem:[%s3380_s3 + $0xa0] sm:$0xff]   ;;  %v2587_v62 = vld [vmem:[%s3380_s3 + $0xe8] sm:$0xff]   ;;  %v2590_v1 = vld [vmem:[%s3380_s3 + $0x30] sm:$0xff]   ;;  %v449_v40 = vunpack.c.0.s8 %v448_v29  ;;  %s2693_s19 = scalar_lea.vmem %s2030_s18, 32  ;;  %p2698_p1 = scmp.lt.s32.totalorder %s2030_s18, %s2030_s18 }
  0x33   :  { %2294 = vmatprep.subr.bf16.mxu1 %v2583_v58  ;;  %v2588_v63 = vld [vmem:[%s3380_s3 + $0xa8] sm:$0xff]   ;;  %v2591_v2 = vld [vmem:[%s3380_s3 + $0xf0] sm:$0xff]   ;;  %v2593_v4 = vld [vmem:[%s3380_s3 + $0x78] sm:$0xff]   ;;  %p2694_p0 = scmp.ne.s32.totalorder %s2030_s18, %s2693_s19  ;;  %p2699_p2 = scmp.lt.s32.totalorder %s2693_s19, %s2693_s19 }
  0x34   :  { %v2592_v3 = vld [vmem:[%s3380_s3 + $0xb0] sm:$0xff]   ;;  %v2594_v5 = vld [vmem:[%s3380_s3 + $0x38] sm:$0xff]   ;;  %v2597_v8 = vld [vmem:[%s3380_s3 + $0x140] sm:$0xff]   ;;  %v2987_v49 = vsub.s32 %v449_v40, %v451_v41 }
  0x35   :  { %2273 = vmatpush3.bf16.msra.mxu0 %v2582_v57  ;;  %v2595_v6 = vld [vmem:[%s3380_s3 + $0xf8] sm:$0xff]   ;;  %v2599_v9 = vld [vmem:[%s3380_s3 + $0x1c0] sm:$0xff]   ;;  %p2700_p3 = por %p2699_p2, %p2698_p1 }
  0x36   :  { %2295 = vmatpush3.bf16.msra.mxu1 %v2584_v59  ;;  %2274 = vmatprep.subr.bf16.mxu0 %v2585_v60  ;;  %v2596_v7 = vld [vmem:[%s3380_s3 + $0xb8] sm:$0xff]   ;;  %v2037_v12 = vld [vmem:[%s3379_s2] ss:$0 sm:$0xff] }
  0x37   :  { %2296 = vmatprep.subr.bf16.mxu1 %v2587_v62  ;;  %v2613_v28 = vld [vmem:[%s3380_s3 + $0x160] sm:$0xff]   ;;  %v2612_v29 = vld [vmem:[%s3380_s3 + $0x198] sm:$0xff]   ;;  %p2701_p4 = pnand %p2700_p3, %p2694_p0 }
  0x38   :  { %v2615_v30 = vld [vmem:[%s3380_s3 + $0x1e0] sm:$0xff]   ;;  %v2625_v41 = vld [vmem:[%s3380_s3 + $0x178] sm:$0xff]  }
  0x39   :  { %2275 = vmatpush3.bf16.msra.mxu0 %v2586_v61 }
  0x3a   :  { %2297 = vmatpush3.bf16.msra.mxu1 %v2588_v63  ;;  %2276 = vmatprep.subr.bf16.mxu0 %v2589_v0 }
  0x3b   :  { %2298 = vmatprep.subr.bf16.mxu1 %v2591_v2 }
  0x3d   :  { %2277 = vmatpush3.bf16.msra.mxu0 %v2590_v1 }
  0x3e   :  { %2299 = vmatpush3.bf16.msra.mxu1 %v2592_v3  ;;  %2278 = vmatprep.subr.bf16.mxu0 %v2593_v4 }
  0x3f   :  { %2300 = vmatprep.subr.bf16.mxu1 %v2595_v6 }
  0x41   :  { %2279 = vmatpush3.bf16.msra.mxu0 %v2594_v5 }
  0x42   :  { %2301 = vmatpush3.bf16.msra.mxu1 %v2596_v7  ;;  %2308 = vmatprep.subr.bf16.mxu0 %v2597_v8  ;;  %v2598_v7 = vld [vmem:[%s3380_s3 + $0x100] sm:$0xff]  }
  0x43   :  { %2330 = vmatprep.subr.bf16.mxu1 %v2599_v9 }
  0xf6   :  { %v2224_v10 = vpop.f32.mrb[0].mxu0 }
  0xf7   :  { %v2252_v11 = vpop.f32.mrb[0].mxu1  ;;  %v2225_v13 = vpop.f32.mrb[1].mxu0 }
  0xf8   :  { %v2226_v14 = vadd.f32 %v2225_v13, %v2224_v10  ;;  %v2253_v15 = vpop.f32.mrb[1].mxu1  ;;  %v2227_v16 = vpop.f32.mrb[2].mxu0  ;;  %v2600_v13 = vld [vmem:[%s3380_s3 + $0x180] sm:$0xff]  }
  0xf9   :  { %v2254_v17 = vadd.f32 %v2253_v15, %v2252_v11  ;;  %v2255_v18 = vpop.f32.mrb[2].mxu1  ;;  %v2228_v19 = vpop.f32.mrb[3].mxu0 }
  0xfa   :  { %v374_v20 = vadd.f32 %v2226_v14, %v2037_v12  ;;  %v2229_v21 = vadd.f32 %v2228_v19, %v2227_v16  ;;  %v2256_v22 = vpop.f32.mrb[3].mxu1  ;;  %v2601_v14 = vld [vmem:[%s3380_s3 + $0x148] sm:$0xff]  }
  0xfb   :  { %v2257_v23 = vadd.f32 %v2256_v22, %v2255_v18  ;;  %v2602_v18 = vld [vmem:[%s3380_s3 + $0x108] sm:$0xff]   ;;  %v2607_v22 = vld [vmem:[%s3380_s3 + $0x1d0] sm:$0xff]  }
  0xfc   :  { %v423_v24 = vadd.f32 %v2254_v17, %v374_v20  ;;  %v377_v25 = vadd.f32 %v2229_v21, %v2037_v12  ;;  %v2603_v17 = vld [vmem:[%s3380_s3 + $0x1c8] sm:$0xff]   ;;  %v2605_v20 = vld [vmem:[%s3380_s3 + $0x150] sm:$0xff]  }
  0xfd   :  { %v2604_v21 = vld [vmem:[%s3380_s3 + $0x188] sm:$0xff]  }
  0xfe   :  { %v426_v26 = vadd.f32 %v2257_v23, %v377_v25  ;;  %v2230_v27 = vpop.f32.mrb[4].mxu0  ;;  %v437_v47 = vmax.f32 %v423_v24, 0.0  ;;  %v2606_v23 = vld [vmem:[%s3380_s3 + $0x110] sm:$0xff]   ;;  %v2609_v24 = vld [vmem:[%s3380_s3 + $0x158] sm:$0xff]  }
  0xff   :  { %v2258_v31 = vpop.f32.mrb[4].mxu1  ;;  %v2231_v32 = vpop.f32.mrb[5].mxu0  ;;  %v2608_v25 = vld [vmem:[%s3380_s3 + $0x190] sm:$0xff]  }
 0x100   :  { %v2232_v33 = vadd.f32 %v2231_v32, %v2230_v27  ;;  %v2259_v34 = vpop.f32.mrb[5].mxu1  ;;  %v2233_v35 = vpop.f32.mrb[6].mxu0  ;;  %v438_v51 = vmax.f32 %v426_v26, 0.0  ;;  %v2611_v26 = vld [vmem:[%s3380_s3 + $0x1d8] sm:$0xff]   ;;  %v2617_v32 = vld [vmem:[%s3380_s3 + $0x168] sm:$0xff]  }
 0x101   :  { %v2260_v36 = vadd.f32 %v2259_v34, %v2258_v31  ;;  %v2261_v37 = vpop.f32.mrb[6].mxu1  ;;  %v2234_v38 = vpop.f32.mrb[7].mxu0  ;;  %v2610_v27 = vld [vmem:[%s3380_s3 + $0x118] sm:$0xff]   ;;  %v2614_v31 = vld [vmem:[%s3380_s3 + $0x120] sm:$0xff]   ;;  %v2619_v34 = vld [vmem:[%s3380_s3 + $0x1e8] sm:$0xff]  }
 0x102   :  { %v382_v39 = vadd.f32 %v2232_v33, %v2037_v12  ;;  %v2235_v42 = vadd.f32 %v2234_v38, %v2233_v35  ;;  %v2262_v43 = vpop.f32.mrb[7].mxu1  ;;  %v2616_v33 = vld [vmem:[%s3380_s3 + $0x1a0] sm:$0xff]   ;;  %v2618_v35 = vld [vmem:[%s3380_s3 + $0x128] sm:$0xff]   ;;  %v2623_v38 = vld [vmem:[%s3380_s3 + $0x1f0] sm:$0xff]  }
 0x103   :  { %v2263_v44 = vadd.f32 %v2262_v43, %v2261_v37  ;;  %v2620_v37 = vld [vmem:[%s3380_s3 + $0x1a8] sm:$0xff]  }
 0x104   :  { %v431_v45 = vadd.f32 %v2260_v36, %v382_v39  ;;  %v385_v46 = vadd.f32 %v2235_v42, %v2037_v12  ;;  %v2621_v36 = vld [vmem:[%s3380_s3 + $0x170] sm:$0xff]  }
 0x105   :  { %v2622_v39 = vld [vmem:[%s3380_s3 + $0x130] sm:$0xff]  }
 0x106   :  { %v439_v48 = vmax.f32 %v431_v45, 0.0  ;;  %v434_v50 = vadd.f32 %v2263_v44, %v385_v46  ;;  %v2624_v42 = vld [vmem:[%s3380_s3 + $0x1b0] sm:$0xff]   ;;  %v2627_v44 = vld [vmem:[%s3380_s3 + $0x1f8] sm:$0xff]  }
 0x107   :  { %v2626_v45 = vld [vmem:[%s3380_s3 + $0x138] sm:$0xff]  }
 0x108   :  { %v445_v52 = vcombine.low %v437_v47, %v439_v48  ;;  %v446_v53 = vcombine.high %v437_v47, %v439_v48  ;;  %v440_v54 = vmax.f32 %v434_v50, 0.0  ;;  %v2629_v47 = vld [vmem:[%s3380_s3 + $0x240] sm:$0xff]   ;;  %v2628_v48 = vld [vmem:[%s3380_s3 + $0x1b8] sm:$0xff]  }
 0x10a   :  { %v453_v55 = vrot.slane %v445_v52, %v2987_v49  ;;  %v2991_v56 = vrot.slane %v446_v53, %v2987_v49  ;;  %v495_v57 = vcombine.low %v438_v51, %v440_v54  ;;  %v496_v58 = vcombine.high %v438_v51, %v440_v54  ;;  %v2631_v51 = vld [vmem:[%s3380_s3 + $0x2c0] sm:$0xff]   ;;  %v2633_v54 = vld [vmem:[%s3380_s3 + $0x248] sm:$0xff]  }
 0x10c   :  { %v469_v59 = vrot.slane %v453_v55, %v2987_v49  ;;  %v2995_v60 = vrot.slane %v495_v57, %v2987_v49  ;;  %v510_v61 = vrot.slane %v496_v58, %v2987_v49  ;;  %v461_v62 = vcombine.high %v453_v55, %v453_v55  ;;  %v2635_v58 = vld [vmem:[%s3380_s3 + $0x2c8] sm:$0xff]  }
 0x10d   :  { %v462_v63 = vcombine.high %v2991_v56, %v2991_v56  ;;  %v476_v43 = vrot.slane %v2991_v56, %v2987_v49  ;;  %v2632_v56 = vld [vmem:[%s3380_s3 + $0x280] sm:$0xff]  }
 0x10e   :  { %v3002_v0 = vrot.slane %v2995_v60, %v2987_v49  ;;  %v3005_v1 = vrot.slane %v510_v61, %v2987_v49  ;;  %v483_v2 = vrot.slane %v461_v62, %v2987_v49  ;;  %v491_v4 = vcombine.high %v469_v59, %v469_v59  ;;  %v2636_v62 = vld [vmem:[%s3380_s3 + $0x288] sm:$0xff]  }
 0x10f   :  { %v490_v3 = vrot.slane %v462_v63, %v2987_v49  ;;  %v512_v5 = vcombine.high %v510_v61, %v510_v61  ;;  %v561_v9 = vpack.c.bf16 %v469_v59, %v469_v59  ;;  %v511_v40 = vcombine.high %v2995_v60, %v2995_v60  ;;  %v2634_v60 = vld [vmem:[%s3380_s3 + $0x208] sm:$0xff]   ;;  %v2637_v61 = vld [vmem:[%s3380_s3 + $0x250] sm:$0xff]  }
 0x110   :  { %v562_v6 = vpack.c.bf16 %v483_v2, %v483_v2  ;;  %v493_v8 = vcombine.high %v483_v2, %v483_v2  ;;  %v563_v15 = vpack.c.bf16 %v491_v4, %v491_v4  ;;  %v492_v50 = vcombine.high %v476_v43, %v476_v43  ;;  %v2639_v63 = vld [vmem:[%s3380_s3 + $0x2d0] sm:$0xff]  }
 0x111   :  { %v494_v10 = vcombine.high %v490_v3, %v490_v3  ;;  %v3013_v11 = vrot.slane %v512_v5, %v2987_v49  ;;  %v566_v16 = vpack.c.bf16 %v490_v3, %v490_v3  ;;  %v533_v46 = vrot.slane %v511_v40, %v2987_v49  ;;  %v2630_v49 = vld [vmem:[%s3380_s3 + $0x200] sm:$0xff]   ;;  %v2638_v2 = vld [vmem:[%s3380_s3 + $0x210] sm:$0xff]   ;;  %v2641_v3 = vld [vmem:[%s3380_s3 + $0x258] sm:$0xff]  }
 0x112   :  { %1640 = vmatprep.mubr.bf16.mxu0 %v562_v6  ;;  %v564_v12 = vpack.c.bf16 %v493_v8, %v493_v8  ;;  %v565_v53 = vpack.c.bf16 %v476_v43, %v476_v43  ;;  %v567_v57 = vpack.c.bf16 %v492_v50, %v492_v50  ;;  %v2640_v4 = vld [vmem:[%s3380_s3 + $0x290] sm:$0xff]   ;;  %v2643_v5 = vld [vmem:[%s3380_s3 + $0x2d8] sm:$0xff]   ;;  %v2680_v50 = vld [vmem:[%s3380_s3 + $0x3a0] sm:$0xff]  }
 0x113   :  { %1641 = vmatmul.mubr.bf16.vlgmr.msra.gmra.mrb[8].mxu0 %v561_v9  ;;  %v568_v19 = vpack.c.bf16 %v494_v10, %v494_v10  ;;  %v543_v52 = vcombine.high %v533_v46, %v533_v46  ;;  %v570_v55 = vpack.c.bf16 %v533_v46, %v533_v46  ;;  %v2642_v6 = vld [vmem:[%s3380_s3 + $0x218] sm:$0xff]   ;;  %v2647_v9 = vld [vmem:[%s3380_s3 + $0x2e0] sm:$0xff]  }
 0x114   :  { %2309 = vmatpush3.bf16.msra.mxu0 %v2598_v7  ;;  %1680 = vmatprep.mubr.bf16.mxu1 %v564_v12  ;;  %v2645_v7 = vld [vmem:[%s3380_s3 + $0x260] sm:$0xff]   ;;  %v2644_v8 = vld [vmem:[%s3380_s3 + $0x298] sm:$0xff]   ;;  %v2649_v12 = vld [vmem:[%s3380_s3 + $0x268] sm:$0xff]  }
 0x115   :  { %1720 = vmatprep.mubr.bf16.mxu0 %v566_v16  ;;  %1681 = vmatmul.mubr.bf16.vlgmr.msra.gmra.mrb[8].mxu1 %v563_v15  ;;  %v572_v59 = vpack.c.bf16 %v543_v52, %v543_v52  ;;  %v2646_v10 = vld [vmem:[%s3380_s3 + $0x220] sm:$0xff]   ;;  %v2650_v15 = vld [vmem:[%s3380_s3 + $0x228] sm:$0xff]   ;;  %v2653_v16 = vld [vmem:[%s3380_s3 + $0x270] sm:$0xff]  }
 0x116   :  { %2331 = vmatpush3.bf16.msra.mxu1 %v2600_v13  ;;  %2310 = vmatprep.subr.bf16.mxu0 %v2601_v14  ;;  %v2648_v13 = vld [vmem:[%s3380_s3 + $0x2a0] sm:$0xff]   ;;  %v2651_v14 = vld [vmem:[%s3380_s3 + $0x2e8] sm:$0xff]   ;;  %v2673_v40 = vld [vmem:[%s3380_s3 + $0x358] sm:$0xff]  }
 0x117   :  { %1760 = vmatprep.mubr.bf16.mxu1 %v568_v19  ;;  %2332 = vmatprep.subr.bf16.mxu1 %v2603_v17  ;;  %v2652_v17 = vld [vmem:[%s3380_s3 + $0x2a8] sm:$0xff]   ;;  %v2654_v19 = vld [vmem:[%s3380_s3 + $0x230] sm:$0xff]   ;;  %v2674_v43 = vld [vmem:[%s3380_s3 + $0x318] sm:$0xff]  }
 0x118   :  { %2311 = vmatpush3.bf16.msra.mxu0 %v2602_v18  ;;  %v2655_v18 = vld [vmem:[%s3380_s3 + $0x2f0] sm:$0xff]   ;;  %v2679_v46 = vld [vmem:[%s3380_s3 + $0x3e0] sm:$0xff]  }
 0x119   :  { %2312 = vmatprep.subr.bf16.mxu0 %v2605_v20  ;;  %v2657_v20 = vld [vmem:[%s3380_s3 + $0x278] sm:$0xff]   ;;  %v2685_v52 = vld [vmem:[%s3380_s3 + $0x370] sm:$0xff]  }
 0x11a   :  { %2333 = vmatpush3.bf16.msra.mxu1 %v2604_v21  ;;  %v2656_v21 = vld [vmem:[%s3380_s3 + $0x2b0] sm:$0xff]  }
 0x11b   :  { %2334 = vmatprep.subr.bf16.mxu1 %v2607_v22  ;;  %v2659_v22 = vld [vmem:[%s3380_s3 + $0x2f8] sm:$0xff]  }
 0x11c   :  { %2313 = vmatpush3.bf16.msra.mxu0 %v2606_v23  ;;  %v2658_v23 = vld [vmem:[%s3380_s3 + $0x238] sm:$0xff]  }
 0x11d   :  { %2314 = vmatprep.subr.bf16.mxu0 %v2609_v24  ;;  %v2661_v24 = vld [vmem:[%s3380_s3 + $0x340] sm:$0xff]  }
 0x11e   :  { %2335 = vmatpush3.bf16.msra.mxu1 %v2608_v25  ;;  %v2660_v25 = vld [vmem:[%s3380_s3 + $0x2b8] sm:$0xff]  }
 0x11f   :  { %2336 = vmatprep.subr.bf16.mxu1 %v2611_v26  ;;  %v541_v26 = vcombine.high %v3002_v0, %v3002_v0 }
 0x120   :  { %2315 = vmatpush3.bf16.msra.mxu0 %v2610_v27  ;;  %v2663_v27 = vld [vmem:[%s3380_s3 + $0x3c0] sm:$0xff]  }
 0x121   :  { %2316 = vmatprep.subr.bf16.mxu0 %v2613_v28  ;;  %v2662_v28 = vld [vmem:[%s3380_s3 + $0x300] sm:$0xff]  }
 0x122   :  { %2337 = vmatpush3.bf16.msra.mxu1 %v2612_v29  ;;  %v544_v29 = vcombine.high %v3013_v11, %v3013_v11 }
 0x123   :  { %2338 = vmatprep.subr.bf16.mxu1 %v2615_v30  ;;  %v569_v30 = vpack.c.bf16 %v3002_v0, %v3002_v0  ;;  %v2667_v0 = vld [vmem:[%s3380_s3 + $0x3c8] sm:$0xff]  }
 0x124   :  { %2317 = vmatpush3.bf16.msra.mxu0 %v2614_v31  ;;  %v2665_v31 = vld [vmem:[%s3380_s3 + $0x348] sm:$0xff]  }
 0x125   :  { %2318 = vmatprep.subr.bf16.mxu0 %v2617_v32  ;;  %v574_v32 = vpack.c.bf16 %v3013_v11, %v3013_v11  ;;  %v2669_v11 = vld [vmem:[%s3380_s3 + $0x350] sm:$0xff]  }
 0x126   :  { %2339 = vmatpush3.bf16.msra.mxu1 %v2616_v33  ;;  %v2664_v33 = vld [vmem:[%s3380_s3 + $0x380] sm:$0xff]  }
 0x127   :  { %2340 = vmatprep.subr.bf16.mxu1 %v2619_v34  ;;  %v571_v34 = vpack.c.bf16 %v541_v26, %v541_v26 }
 0x128   :  { %2319 = vmatpush3.bf16.msra.mxu0 %v2618_v35  ;;  %v576_v35 = vpack.c.bf16 %v544_v29, %v544_v29  ;;  %v2078_v29 = vld [vmem:[%s3381_s4] ss:$0 sm:$0xff] }
 0x129   :  { %2320 = vmatprep.subr.bf16.mxu0 %v2621_v36  ;;  %v2666_v36 = vld [vmem:[%s3380_s3 + $0x308] sm:$0xff]  }
 0x12a   :  { %2341 = vmatpush3.bf16.msra.mxu1 %v2620_v37  ;;  %v2668_v37 = vld [vmem:[%s3380_s3 + $0x388] sm:$0xff]  }
 0x12b   :  { %2342 = vmatprep.subr.bf16.mxu1 %v2623_v38  ;;  %v2671_v38 = vld [vmem:[%s3380_s3 + $0x3d0] sm:$0xff]  }
 0x12c   :  { %2321 = vmatpush3.bf16.msra.mxu0 %v2622_v39  ;;  %v2670_v39 = vld [vmem:[%s3380_s3 + $0x310] sm:$0xff]  }
 0x12d   :  { %2322 = vmatprep.subr.bf16.mxu0 %v2625_v41  ;;  %v2672_v41 = vld [vmem:[%s3380_s3 + $0x390] sm:$0xff]  }
 0x12e   :  { %2343 = vmatpush3.bf16.msra.mxu1 %v2624_v42  ;;  %v2675_v42 = vld [vmem:[%s3380_s3 + $0x3d8] sm:$0xff]  }
 0x12f   :  { %2344 = vmatprep.subr.bf16.mxu1 %v2627_v44  ;;  %v2677_v44 = vld [vmem:[%s3380_s3 + $0x360] sm:$0xff]  }
 0x130   :  { %2323 = vmatpush3.bf16.msra.mxu0 %v2626_v45  ;;  %v2676_v45 = vld [vmem:[%s3380_s3 + $0x398] sm:$0xff]  }
 0x131   :  { %2352 = vmatprep.subr.bf16.mxu0 %v2629_v47  ;;  %v2678_v47 = vld [vmem:[%s3380_s3 + $0x320] sm:$0xff]  }
 0x132   :  { %2345 = vmatpush3.bf16.msra.mxu1 %v2628_v48  ;;  %v2681_v48 = vld [vmem:[%s3380_s3 + $0x368] sm:$0xff]  }
 0x133   :  { %1721 = vmatmul.mubr.bf16.vlgmr.msra.gmra.mrb[12].mxu0 %v565_v53  ;;  %2374 = vmatprep.subr.bf16.mxu1 %v2631_v51  ;;  %v2683_v51 = vld [vmem:[%s3380_s3 + $0x3e8] sm:$0xff]  }
 0x134   :  { %2353 = vmatpush3.bf16.msra.mxu0 %v2630_v49  ;;  %1800 = vmatprep.mubr.bf16.mxu0 %v570_v55  ;;  %v2682_v49 = vld [vmem:[%s3380_s3 + $0x328] sm:$0xff]   ;;  %v2686_v55 = vld [vmem:[%s3380_s3 + $0x330] sm:$0xff]  }
 0x135   :  { %1761 = vmatmul.mubr.bf16.vlgmr.msra.gmra.mrb[12].mxu1 %v567_v57  ;;  %2354 = vmatprep.subr.bf16.mxu0 %v2633_v54  ;;  %v2684_v53 = vld [vmem:[%s3380_s3 + $0x3a8] sm:$0xff]   ;;  %v2687_v54 = vld [vmem:[%s3380_s3 + $0x3f0] sm:$0xff]  }
 0x136   :  { %2375 = vmatpush3.bf16.msra.mxu1 %v2632_v56  ;;  %1840 = vmatprep.mubr.bf16.mxu1 %v572_v59  ;;  %v2689_v56 = vld [vmem:[%s3380_s3 + $0x378] sm:$0xff]   ;;  %v2688_v57 = vld [vmem:[%s3380_s3 + $0x3b0] sm:$0xff]  }
 0x137   :  { %2376 = vmatprep.subr.bf16.mxu1 %v2635_v58  ;;  %v2691_v58 = vld [vmem:[%s3380_s3 + $0x3f8] sm:$0xff]  }
 0x138   :  { %2355 = vmatpush3.bf16.msra.mxu0 %v2634_v60  ;;  %v2690_v59 = vld [vmem:[%s3380_s3 + $0x338] sm:$0xff]  }
 0x139   :  { %2356 = vmatprep.subr.bf16.mxu0 %v2637_v61  ;;  %v2692_v60 = vld [vmem:[%s3380_s3 + $0x3b8] sm:$0xff]   ;;  %v542_v61 = vcombine.high %v3005_v1, %v3005_v1 }
 0x13a   :  { %2377 = vmatpush3.bf16.msra.mxu1 %v2636_v62  ;;  %v573_v62 = vpack.c.bf16 %v3005_v1, %v3005_v1  ;;  %v1932_v1 = vld [vmem:[%s3382_s5 + $0x18] sm:$0xff] }
 0x13b   :  { %2378 = vmatprep.subr.bf16.mxu1 %v2639_v63  ;;  %v575_v63 = vpack.c.bf16 %v542_v61, %v542_v61 }
 0x13c   :  { %2357 = vmatpush3.bf16.msra.mxu0 %v2638_v2  ;;  %v1929_v2 = vld [vmem:[%s3382_s5] sm:$0xff] }
 0x13d   :  { %2358 = vmatprep.subr.bf16.mxu0 %v2641_v3  ;;  %v1930_v3 = vld [vmem:[%s3382_s5 + $0x8] sm:$0xff] }
 0x13e   :  { %2379 = vmatpush3.bf16.msra.mxu1 %v2640_v4  ;;  %v1931_v4 = vld [vmem:[%s3382_s5 + $0x10] sm:$0xff] }
 0x13f   :  { %2380 = vmatprep.subr.bf16.mxu1 %v2643_v5  ;;  %v2718_v5 = vmov 0.0|0.0  }
 0x140   :  { %2359 = vmatpush3.bf16.msra.mxu0 %v2642_v6  ;;  %v2493_v6 = vpack.c.bf16 %v1930_v3, %v1929_v2 }
 0x141   :  { %2360 = vmatprep.subr.bf16.mxu0 %v2645_v7  ;;  %v2496_v7 = vpack.c.bf16 %v1932_v1, %v1931_v4 }
 0x142   :  { %2381 = vmatpush3.bf16.msra.mxu1 %v2644_v8  ;;  %v1933_v8 = vld [vmem:[%s3382_s5 + $0x20] sm:$0xff] }
 0x143   :  { %2382 = vmatprep.subr.bf16.mxu1 %v2647_v9  ;;  %v1934_v9 = vld [vmem:[%s3382_s5 + $0x28] sm:$0xff] }
 0x144   :  { %2361 = vmatpush3.bf16.msra.mxu0 %v2646_v10  ;;  %v2499_v10 = vpack.c.bf16 %v1934_v9, %v1933_v8 }
 0x145   :  { %2362 = vmatprep.subr.bf16.mxu0 %v2649_v12  ;;  %v1935_v12 = vld [vmem:[%s3382_s5 + $0x30] sm:$0xff] }
 0x146   :  { %2383 = vmatpush3.bf16.msra.mxu1 %v2648_v13  ;;  %v1936_v13 = vld [vmem:[%s3382_s5 + $0x38] sm:$0xff] }
 0x147   :  { %2384 = vmatprep.subr.bf16.mxu1 %v2651_v14  ;;  %v2502_v14 = vpack.c.bf16 %v1936_v13, %v1935_v12 }
 0x148   :  { %2363 = vmatpush3.bf16.msra.mxu0 %v2650_v15  ;;  %v1937_v15 = vld [vmem:[%s3382_s5 + $0x40] sm:$0xff] }
 0x149   :  { %2364 = vmatprep.subr.bf16.mxu0 %v2653_v16  ;;  %v1938_v16 = vld [vmem:[%s3382_s5 + $0x48] sm:$0xff] }
 0x14a   :  { %2385 = vmatpush3.bf16.msra.mxu1 %v2652_v17  ;;  %v2505_v17 = vpack.c.bf16 %v1938_v16, %v1937_v15 }
 0x14b   :  { %2386 = vmatprep.subr.bf16.mxu1 %v2655_v18  ;;  %v1939_v18 = vld [vmem:[%s3382_s5 + $0x50] sm:$0xff] }
 0x14c   :  { %2365 = vmatpush3.bf16.msra.mxu0 %v2654_v19  ;;  %v1940_v19 = vld [vmem:[%s3382_s5 + $0x58] sm:$0xff] }
 0x14d   :  { %2366 = vmatprep.subr.bf16.mxu0 %v2657_v20  ;;  %v2508_v20 = vpack.c.bf16 %v1940_v19, %v1939_v18 }
 0x14e   :  { %2387 = vmatpush3.bf16.msra.mxu1 %v2656_v21  ;;  %v1941_v21 = vld [vmem:[%s3382_s5 + $0x60] sm:$0xff] }
 0x14f   :  { %2388 = vmatprep.subr.bf16.mxu1 %v2659_v22  ;;  %v1942_v22 = vld [vmem:[%s3382_s5 + $0x68] sm:$0xff] }
 0x150   :  { %2367 = vmatpush3.bf16.msra.mxu0 %v2658_v23  ;;  %v2511_v23 = vpack.c.bf16 %v1942_v22, %v1941_v21 }
 0x151   :  { %2396 = vmatprep.subr.bf16.mxu0 %v2661_v24  ;;  %v1943_v24 = vld [vmem:[%s3382_s5 + $0x70] sm:$0xff] }
 0x152   :  { %2389 = vmatpush3.bf16.msra.mxu1 %v2660_v25  ;;  %v1944_v25 = vld [vmem:[%s3382_s5 + $0x78] sm:$0xff] }
 0x153   :  { %1801 = vmatmul.mubr.bf16.vlgmr.msra.gmra.mrb[16].mxu0 %v569_v30  ;;  %2418 = vmatprep.subr.bf16.mxu1 %v2663_v27  ;;  %v2514_v26 = vpack.c.bf16 %v1944_v25, %v1943_v24  ;;  %v2720_v27 = vmov 0.0  }
 0x154   :  { %2397 = vmatpush3.bf16.msra.mxu0 %v2662_v28  ;;  %1880 = vmatprep.mubr.bf16.mxu0 %v574_v32 }
 0x155   :  { %1841 = vmatmul.mubr.bf16.vlgmr.msra.gmra.mrb[16].mxu1 %v571_v34  ;;  %2398 = vmatprep.subr.bf16.mxu0 %v2665_v31 }
 0x156   :  { %2419 = vmatpush3.bf16.msra.mxu1 %v2664_v33  ;;  %1920 = vmatprep.mubr.bf16.mxu1 %v576_v35 }
 0x157   :  { %2420 = vmatprep.subr.bf16.mxu1 %v2667_v0 }
 0x158   :  { %2399 = vmatpush3.bf16.msra.mxu0 %v2666_v36 }
 0x159   :  { %2400 = vmatprep.subr.bf16.mxu0 %v2669_v11 }
 0x15a   :  { %2421 = vmatpush3.bf16.msra.mxu1 %v2668_v37 }
 0x15b   :  { %2422 = vmatprep.subr.bf16.mxu1 %v2671_v38 }
 0x15c   :  { %2401 = vmatpush3.bf16.msra.mxu0 %v2670_v39 }
 0x15d   :  { %2402 = vmatprep.subr.bf16.mxu0 %v2673_v40 }
 0x15e   :  { %2423 = vmatpush3.bf16.msra.mxu1 %v2672_v41 }
 0x15f   :  { %2424 = vmatprep.subr.bf16.mxu1 %v2675_v42 }
 0x160   :  { %2403 = vmatpush3.bf16.msra.mxu0 %v2674_v43 }
 0x161   :  { %2404 = vmatprep.subr.bf16.mxu0 %v2677_v44 }
 0x162   :  { %2425 = vmatpush3.bf16.msra.mxu1 %v2676_v45 }
 0x163   :  { %2426 = vmatprep.subr.bf16.mxu1 %v2679_v46 }
 0x164   :  { %2405 = vmatpush3.bf16.msra.mxu0 %v2678_v47 }
 0x165   :  { %2406 = vmatprep.subr.bf16.mxu0 %v2681_v48 }
 0x166   :  { %2427 = vmatpush3.bf16.msra.mxu1 %v2680_v50 }
 0x167   :  { %2428 = vmatprep.subr.bf16.mxu1 %v2683_v51 }
 0x168   :  { %2407 = vmatpush3.bf16.msra.mxu0 %v2682_v49 }
 0x169   :  { %2408 = vmatprep.subr.bf16.mxu0 %v2685_v52 }
 0x16a   :  { %2429 = vmatpush3.bf16.msra.mxu1 %v2684_v53 }
 0x16b   :  { %2430 = vmatprep.subr.bf16.mxu1 %v2687_v54 }
 0x16c   :  { %2409 = vmatpush3.bf16.msra.mxu0 %v2686_v55 }
 0x16d   :  { %2410 = vmatprep.subr.bf16.mxu0 %v2689_v56 }
 0x16e   :  { %2431 = vmatpush3.bf16.msra.mxu1 %v2688_v57 }
 0x16f   :  { %2432 = vmatprep.subr.bf16.mxu1 %v2691_v58 }
 0x170   :  { %2411 = vmatpush3.bf16.msra.mxu0 %v2690_v59 }
 0x171   :  { %2492 = vmatprep.subr.bf16.mxu0 %v2718_v5 }
 0x172   :  { %2433 = vmatpush3.bf16.msra.mxu1 %v2692_v60 }
 0x173   :  { %1881 = vmatmul.mubr.bf16.vlgmr.msra.gmra.mrb[20].mxu0 %v573_v62 }
 0x174   :  { %2494 = vmatpush3.bf16.msra.mxu0 %v2493_v6  ;;  %2489 = vmatprep.mubr.msk.f32.mxu0 %vm2719_vm0, %v2720_v27 }
 0x175   :  { %1921 = vmatmul.mubr.bf16.vlgmr.msra.gmra.mrb[20].mxu1 %v575_v63  ;;  %2495 = vmatprep.subr.bf16.mxu0 %v2718_v5 }
 0x178   :  { %2497 = vmatpush3.bf16.msra.mxu0 %v2496_v7 }
 0x179   :  { %2498 = vmatprep.subr.bf16.mxu0 %v2718_v5 }
 0x17c   :  { %2500 = vmatpush3.bf16.msra.mxu0 %v2499_v10 }
 0x17d   :  { %2501 = vmatprep.subr.bf16.mxu0 %v2718_v5 }
 0x180   :  { %2503 = vmatpush3.bf16.msra.mxu0 %v2502_v14  ;;  %v2207_v14 = vld [vmem:[%s3383_s6] ss:$0 sm:$0xff] }
 0x181   :  { %2504 = vmatprep.subr.bf16.mxu0 %v2718_v5 }
 0x184   :  { %2506 = vmatpush3.bf16.msra.mxu0 %v2505_v17 }
 0x185   :  { %2507 = vmatprep.subr.bf16.mxu0 %v2718_v5 }
 0x188   :  { %2509 = vmatpush3.bf16.msra.mxu0 %v2508_v20 }
 0x189   :  { %2510 = vmatprep.subr.bf16.mxu0 %v2718_v5 }
 0x18c   :  { %2512 = vmatpush3.bf16.msra.mxu0 %v2511_v23 }
 0x18d   :  { %2513 = vmatprep.subr.bf16.mxu0 %v2718_v5 }
 0x190   :  { %2515 = vmatpush3.bf16.msra.mxu0 %v2514_v26 }
 0x1e6   :  { %v2280_v28 = vpop.f32.mrb[8].mxu0 }
 0x1e7   :  { %v2281_v30 = vpop.f32.mrb[9].mxu0 }
 0x1e8   :  { %v2282_v31 = vadd.f32 %v2281_v30, %v2280_v28  ;;  %v2283_v32 = vpop.f32.mrb[10].mxu0  ;;  %v2302_v33 = vpop.f32.mrb[8].mxu1 }
 0x1e9   :  { %v2284_v34 = vpop.f32.mrb[11].mxu0  ;;  %v2303_v0 = vpop.f32.mrb[9].mxu1 }
 0x1ea   :  { %v1643_v35 = vadd.f32 %v2282_v31, %v2078_v29  ;;  %v2304_v36 = vadd.f32 %v2303_v0, %v2302_v33  ;;  %v2305_v11 = vpop.f32.mrb[10].mxu1 }
 0x1eb   :  { %v2306_v37 = vpop.f32.mrb[11].mxu1 }
 0x1ec   :  { %v1683_v38 = vadd.f32 %v2304_v36, %v1643_v35 }
 0x206   :  { %v2324_v39 = vpop.f32.mrb[12].mxu0 }
 0x207   :  { %v2325_v40 = vpop.f32.mrb[13].mxu0 }
 0x208   :  { %v2326_v41 = vadd.f32 %v2325_v40, %v2324_v39  ;;  %v2327_v42 = vpop.f32.mrb[14].mxu0  ;;  %v2346_v43 = vpop.f32.mrb[12].mxu1 }
 0x209   :  { %v2328_v44 = vpop.f32.mrb[15].mxu0  ;;  %v2347_v45 = vpop.f32.mrb[13].mxu1 }
 0x20a   :  { %v1723_v46 = vadd.f32 %v2326_v41, %v1683_v38  ;;  %v2348_v47 = vadd.f32 %v2347_v45, %v2346_v43  ;;  %v2349_v48 = vpop.f32.mrb[14].mxu1 }
 0x20b   :  { %v2350_v50 = vpop.f32.mrb[15].mxu1 }
 0x20c   :  { %v1763_v51 = vadd.f32 %v2348_v47, %v1723_v46 }
 0x226   :  { %v2368_v49 = vpop.f32.mrb[16].mxu0 }
 0x227   :  { %v2369_v52 = vpop.f32.mrb[17].mxu0 }
 0x228   :  { %v2370_v53 = vadd.f32 %v2369_v52, %v2368_v49  ;;  %v2371_v54 = vpop.f32.mrb[18].mxu0  ;;  %v2390_v55 = vpop.f32.mrb[16].mxu1 }
 0x229   :  { %v2372_v56 = vpop.f32.mrb[19].mxu0  ;;  %v2391_v57 = vpop.f32.mrb[17].mxu1 }
 0x22a   :  { %v1803_v58 = vadd.f32 %v2370_v53, %v1763_v51  ;;  %v2392_v59 = vadd.f32 %v2391_v57, %v2390_v55  ;;  %v2393_v60 = vpop.f32.mrb[18].mxu1 }
 0x22b   :  { %v2394_v61 = vpop.f32.mrb[19].mxu1 }
 0x22c   :  { %v1843_v62 = vadd.f32 %v2392_v59, %v1803_v58 }
 0x246   :  { %v2412_v63 = vpop.f32.mrb[20].mxu0 }
 0x247   :  { %v2413_v2 = vpop.f32.mrb[21].mxu0 }
 0x248   :  { %v2414_v3 = vadd.f32 %v2413_v2, %v2412_v63  ;;  %v2415_v4 = vpop.f32.mrb[22].mxu0  ;;  %v2434_v5 = vpop.f32.mrb[20].mxu1 }
 0x249   :  { %v2416_v6 = vpop.f32.mrb[23].mxu0  ;;  %v2435_v1 = vpop.f32.mrb[21].mxu1 }
 0x24a   :  { %v1883_v7 = vadd.f32 %v2414_v3, %v1843_v62  ;;  %v2436_v8 = vadd.f32 %v2435_v1, %v2434_v5  ;;  %v2437_v9 = vpop.f32.mrb[22].mxu1 }
 0x24b   :  { %v2438_v10 = vpop.f32.mrb[23].mxu1 }
 0x24c   :  { %v1923_v12 = vadd.f32 %v2436_v8, %v1883_v7 }
 0x24e   :  { %v1928_v13 = vmax.f32 %v1923_v12, 0.0 }
 0x250   :  { %2490 = vmatmul.mubr.f32.vlgmr.msra.gmra.mrb[24].mxu0 %v1928_v13 }
 0x323   :  { %v2018_v15 = vpop.f32.mrb[24].mxu0 }
 0x324   :  { %v2019_v16 = vadd.f32 %v2207_v14, %v2018_v15  ;;  %v2491_v17 = vpop.f32.mrb[25].mxu0 }
 0x326   :  { %2022 = vst [vmem:[#allocation2] sm:$0x3] %v2019_v16 }
 0x327   :  { %2704 = shalt.err (!%p2701_p4)
}
 0x328   :  { %s2705_s21 = scalar_lea.hbm %s3384_s7, 32 }
 0x329   :  { %p2706_p5 = scmp.ne.s32.totalorder %s3384_s7, %s2705_s21  ;;  %p2709_p6 = scmp.lt.u32.totalorder %s2705_s21, %s3384_s7 }
 0x32b   :  { %p2711_p7 = pnand %p2709_p6, %p2706_p5 }
 0x32d   :  { %2714 = shalt.err (!%p2711_p7)
}
 0x32e   :  { %2032 = dma.vmem_to_hbm [thread:$0]  %s2030_s18, 32, %s3384_s7, [#allocation3]  }
 0x32f   :  { %2715 = dma.done.wait [#allocation3], 32  }
 0x330   :  { %2716 = vsyncadd [#allocation3], 4294967264 }
 0x331   :  { %2036 = vsyncpa [#allocation3], 1 }

</bundles_post_ra>
